<compile_context>
chip_gen: v7x
topology: tpu7x:2x2x1
jax: 0.10.0
libtpu: 0.0.40
codegen_flags: <defaults>
</compile_context>

<pallas_src>
import functools

import jax
import jax.numpy as jnp
from jax.experimental import pallas as pl
from jax.experimental.pallas import tpu as pltpu


def _round_up(x, m):
    return ((x + m - 1) // m) * m


# ---------------------------------------------------------------------------
# Kernels
# ---------------------------------------------------------------------------
def _collapsed_kernel(x_ref, adj_ref, w1_ref, b1_ref, w2_ref, b2_ref,
                      out_ref, *, K, Fd, V, N):
    """All V views in one grid step; first Linear as a per-hop accumulation."""
    xk = x_ref[...]                                          # [V*N, F]
    # Hop-0 contribution of the first Linear (M = V*N rows in one matmul).
    h = jnp.dot(xk, w1_ref[0:Fd, :], preferred_element_type=jnp.float32)
    for k in range(1, K + 1):                                # static unroll
        # Per-view propagation x_v <- A_v @ x_v (V independent small matmuls).
        xk = jnp.concatenate(
            [jnp.dot(adj_ref[v], xk[v * N:(v + 1) * N, :],
                     preferred_element_type=jnp.float32)
             for v in range(V)], axis=0)                     # [V*N, F]
        # Accumulate this hop's W1 stripe (static row slice of w1_ref);
        # independent of the next hop, so it interleaves with the hop chain.
        h = h + jnp.dot(xk, w1_ref[k * Fd:(k + 1) * Fd, :],
                        preferred_element_type=jnp.float32)
    h = jnp.maximum(h + b1_ref[...], 0.0)                    # [V*N, h2p]
    out_ref[...] = (jnp.dot(h, w2_ref[...],
                            preferred_element_type=jnp.float32)
                    + b2_ref[...])                           # [V*N, H]


def _per_view_kernel(x_ref, adj_ref, w1_ref, b1_ref, w2_ref, b2_ref,
                     out_ref, *, K, Fd):
    """One view per grid step (fallback when V*adj does not fit VMEM)."""
    xk = x_ref[...]                                          # [N, F]
    adj = adj_ref[...]                                       # [N, N]
    h = jnp.dot(xk, w1_ref[0:Fd, :], preferred_element_type=jnp.float32)
    for k in range(1, K + 1):
        xk = jnp.dot(adj, xk, preferred_element_type=jnp.float32)
        h = h + jnp.dot(xk, w1_ref[k * Fd:(k + 1) * Fd, :],
                        preferred_element_type=jnp.float32)
    h = jnp.maximum(h + b1_ref[...], 0.0)
    out_ref[...] = (jnp.dot(h, w2_ref[...],
                            preferred_element_type=jnp.float32)
                    + b2_ref[...])


# ---------------------------------------------------------------------------
# pallas_call builders
# ---------------------------------------------------------------------------
def _cost_estimate(V, N, Fd, K, h2p, H):
    cat_w = Fd * (K + 1)
    flops = V * (2 * K * N * N * Fd            # hop chain
                 + 2 * N * cat_w * h2p         # first Linear
                 + 2 * N * h2p * H)            # second Linear
    bytes_accessed = 4 * (V * N * Fd + V * N * N            # x, adj
                          + cat_w * h2p + h2p + h2p * H + H  # weights
                          + V * N * H)                       # out
    return pl.CostEstimate(flops=int(flops), transcendentals=0,
                           bytes_accessed=int(bytes_accessed))


def _compiler_params(semantics, vmem_need_bytes):
    kwargs = dict(dimension_semantics=semantics)
    if vmem_need_bytes > 24 * 1024 * 1024:
        # Raise the scoped limit explicitly, capped under v7x's 64 MiB VMEM.
        kwargs["vmem_limit_bytes"] = int(min(vmem_need_bytes * 5 // 4,
                                             60 * 1024 * 1024))
    return pltpu.CompilerParams(**kwargs)


def make_collapsed_encoder(V, N, Fd, h2p, H, K):
    """Single grid step over all views; encoder matmuls over M = V*N rows."""
    cat_w = Fd * (K + 1)
    vmem_need = 2 * 4 * (V * N * Fd + V * N * N + V * N * H
                         + cat_w * h2p + h2p + h2p * H + H)
    kernel = functools.partial(_collapsed_kernel, K=K, Fd=Fd, V=V, N=N)
    return pl.pallas_call(
        kernel,
        out_shape=jax.ShapeDtypeStruct((V * N, H), jnp.float32),
        grid=(1,),
        in_specs=[
            pl.BlockSpec((V * N, Fd), lambda i: (0, 0)),        # x (flat)
            pl.BlockSpec((V, N, N), lambda i: (0, 0, 0)),       # adj
            pl.BlockSpec((cat_w, h2p), lambda i: (0, 0)),       # W1 (padded)
            pl.BlockSpec((1, h2p), lambda i: (0, 0)),           # b1 (padded)
            pl.BlockSpec((h2p, H), lambda i: (0, 0)),           # W2
            pl.BlockSpec((1, H), lambda i: (0, 0)),             # b2
        ],
        out_specs=pl.BlockSpec((V * N, H), lambda i: (0, 0)),
        compiler_params=_compiler_params(("arbitrary",), vmem_need),
        cost_estimate=_cost_estimate(V, N, Fd, K, h2p, H),
    )


def make_per_view_encoder(V, N, Fd, h2p, H, K):
    """grid=(V,) fallback; shared weights stay VMEM-resident across the grid."""
    cat_w = Fd * (K + 1)
    vmem_need = 2 * 4 * (N * Fd + N * N + N * H
                         + cat_w * h2p + h2p + h2p * H + H)
    kernel = functools.partial(_per_view_kernel, K=K, Fd=Fd)
    # TODO(synk): on v7x single-buffer the constant-index weight blocks and
    #   make the parallel extent even (or lead with an N/tm axis) so the
    #   2-TensorCore megacore split is balanced.
    return pl.pallas_call(
        kernel,
        out_shape=jax.ShapeDtypeStruct((V, N, H), jnp.float32),
        grid=(V,),
        in_specs=[
            pl.BlockSpec((None, N, Fd), lambda v: (v, 0, 0)),   # x
            pl.BlockSpec((None, N, N), lambda v: (v, 0, 0)),    # adj
            pl.BlockSpec((cat_w, h2p), lambda v: (0, 0)),       # W1 resident
            pl.BlockSpec((1, h2p), lambda v: (0, 0)),           # b1
            pl.BlockSpec((h2p, H), lambda v: (0, 0)),           # W2
            pl.BlockSpec((1, H), lambda v: (0, 0)),             # b2
        ],
        out_specs=pl.BlockSpec((None, N, H), lambda v: (v, 0, 0)),
        compiler_params=_compiler_params(("parallel",), vmem_need),
        cost_estimate=_cost_estimate(V, N, Fd, K, h2p, H),
    )


# ---------------------------------------------------------------------------
# Module wrapper
# ---------------------------------------------------------------------------
class TransgraphPallas:
    """JAX/Pallas equivalent of the PyTorch Transgraph forward pass.

    Only forward() is reproduced (readout / margin-ranking loss are unused
    there).  All views are assumed to share the same node count N.
    """

    _COLLAPSE_VMEM_BUDGET = 24 * 1024 * 1024   # safe under every gen's default

    def __init__(self, input_dim, num_view, hops, hidden_dim, key):
        self.input_dim = input_dim
        self.num_view = num_view
        self.hops = hops
        self.hidden_dim = hidden_dim

        in_dim = input_dim * (hops + 1)
        h2 = hidden_dim // 2
        k1, k2 = jax.random.split(key)
        # Deterministic synthetic weights (one encoder shared by all views).
        self.w1 = (jax.random.normal(k1, (in_dim, h2), jnp.float32)
                   / jnp.sqrt(in_dim))
        self.b1 = jnp.zeros((1, h2), jnp.float32)
        self.w2 = (jax.random.normal(k2, (h2, hidden_dim), jnp.float32)
                   / jnp.sqrt(h2))
        self.b2 = jnp.zeros((1, hidden_dim), jnp.float32)

        # Lane-pad ONLY the internal hidden width; the pad is mathematically
        # inert (relu(0)=0 and zero W2 rows).  The output keeps hidden_dim.
        self.h2p = _round_up(h2, 128)
        self.w1_pad = jnp.zeros((in_dim, self.h2p), jnp.float32
                                ).at[:, :h2].set(self.w1)
        self.b1_pad = jnp.zeros((1, self.h2p), jnp.float32
                                ).at[:, :h2].set(self.b1)
        self.w2_pad = jnp.zeros((self.h2p, hidden_dim), jnp.float32
                                ).at[:h2, :].set(self.w2)

        self._fwd_cache = {}   # (V, N) -> jitted forward

    def _get_fwd(self, V, N):
        cache_key = (V, N)
        if cache_key in self._fwd_cache:
            return self._fwd_cache[cache_key]

        Fd, H, h2p, K = self.input_dim, self.hidden_dim, self.h2p, self.hops
        cat_w = Fd * (K + 1)
        collapsed_bytes = 2 * 4 * (V * N * Fd + V * N * N + V * N * H
                                   + cat_w * h2p + h2p + h2p * H + H)

        if collapsed_bytes <= self._COLLAPSE_VMEM_BUDGET:
            enc = make_collapsed_encoder(V, N, Fd, h2p, H, K)

            @jax.jit
            def fwd(x_stack, adj_stack, w1, b1, w2, b2):
                out = enc(x_stack.reshape(V * N, Fd), adj_stack,
                          w1, b1, w2, b2)                    # [V*N, H]
                return out.reshape(V, N, H)
        else:
            # TODO(synk): for very large N, row-tile adj to (tm, N) with a
            #   grid over N/tm instead of whole-[N,N]-in-VMEM.
            enc = make_per_view_encoder(V, N, Fd, h2p, H, K)

            @jax.jit
            def fwd(x_stack, adj_stack, w1, b1, w2, b2):
                return enc(x_stack, adj_stack, w1, b1, w2, b2)  # [V, N, H]

        self._fwd_cache[cache_key] = fwd
        return fwd

    def __call__(self, x_list, adj_list):
        # PyTorch forward encodes views 0..num_view-1 and then (x[-1], adj[-1])
        # once more; encode every unique graph exactly once and alias.
        idxs = list(range(self.num_view)) + [len(x_list) - 1]
        uniq, pos = [], {}
        for i in idxs:
            if i not in pos:
                pos[i] = len(uniq)
                uniq.append(i)

        x_stack = jnp.stack([jnp.asarray(x_list[i], jnp.float32)
                             for i in uniq])                  # [V, N, F]
        adj_stack = jnp.stack([jnp.asarray(adj_list[i], jnp.float32)
                               for i in uniq])                # [V, N, N]
        V, N = x_stack.shape[0], x_stack.shape[1]

        fwd = self._get_fwd(V, N)
        out = fwd(x_stack, adj_stack, self.w1_pad, self.b1_pad,
                  self.w2_pad, self.b2)                       # [V, N, H]

        # matches the PyTorch per-view .squeeze()
        return [jnp.squeeze(out[pos[i]]) for i in idxs]

    # Pure-JAX reference (mirrors the PyTorch module) for correctness checks.
    def reference(self, x_list, adj_list):
        def comm(feat, adj):
            nf = feat
            xx = feat
            for _ in range(self.hops):
                xx = adj @ xx
                nf = jnp.concatenate([nf, xx], axis=1)
            return nf

        def encode(t):
            h = jnp.maximum(t @ self.w1 + self.b1, 0.0)
            return h @ self.w2 + self.b2

        idxs = list(range(self.num_view)) + [len(x_list) - 1]
        return [jnp.squeeze(encode(comm(jnp.asarray(x_list[i], jnp.float32),
                                        jnp.asarray(adj_list[i], jnp.float32))))
                for i in idxs]


if __name__ == "__main__":
    # Shapes consistent with the module: config.num_view=2, config.hops=3,
    # config.hidden_dim=32, input_dim=8, N=16 nodes per view; forward also
    # consumes the extra (x[-1], adj[-1]) entry.
    num_view, hops, hidden_dim, input_dim, N = 2, 3, 32, 8, 16
    n_graphs = num_view + 1

    key = jax.random.PRNGKey(0)
    kmodel, kx, kadj = jax.random.split(key, 3)

    xs, adjs = [], []
    xkeys = jax.random.split(kx, n_graphs)
    akeys = jax.random.split(kadj, n_graphs)
    for g in range(n_graphs):
        xs.append(jax.random.normal(xkeys[g], (N, input_dim), jnp.float32))
        a = jax.random.uniform(akeys[g], (N, N), jnp.float32)
        a = (a > 0.7).astype(jnp.float32)
        a = a + a.T + jnp.eye(N, dtype=jnp.float32)     # symmetric + self loops
        deg = jnp.sum(a, axis=1, keepdims=True)
        adjs.append(a / jnp.maximum(deg, 1.0))          # row-normalized adj

    model = TransgraphPallas(input_dim, num_view, hops, hidden_dim, kmodel)

    outs = model(xs, adjs)
    outs = [jax.block_until_ready(o) for o in outs]

    refs = model.reference(xs, adjs)
    assert len(outs) == num_view + 1
    for o, r in zip(outs, refs):
        assert o.shape == (N, hidden_dim)
        # Tolerance covers the MXU's default-precision f32 matmul passes,
        # which may differ between the Mosaic kernel and the XLA reference.
        assert jnp.allclose(o, r, atol=2e-2, rtol=2e-2), "mismatch vs reference"

    print("KERNEL_OK")
</pallas_src>

<mosaic_0001>
module attributes {stable_mosaic.version = 11 : i64} {
  func.func @_collapsed_kernel(%arg0: i32, %arg1: memref<48x8xf32, #tpu.memory_space<vmem>>, %arg2: memref<3x16x16xf32, #tpu.memory_space<vmem>>, %arg3: memref<32x128xf32, #tpu.memory_space<vmem>>, %arg4: memref<1x128xf32, #tpu.memory_space<vmem>>, %arg5: memref<128x32xf32, #tpu.memory_space<vmem>>, %arg6: memref<1x32xf32, #tpu.memory_space<vmem>>, %arg7: memref<48x32xf32, #tpu.memory_space<vmem>>) attributes {dimension_semantics = [#tpu.dimension_semantics<arbitrary>], iteration_bounds = array<i64: 1>, scalar_prefetch = 0 : i64, scratch_operands = 0 : i64, tpu.core_type = #tpu.core_type<tc>, window_params = [{pipeline_mode = #tpu.pipeline_mode<synchronous>, transform_indices = @transform_0, window_bounds = array<i64: 48, 8>}, {pipeline_mode = #tpu.pipeline_mode<synchronous>, transform_indices = @transform_1, window_bounds = array<i64: 3, 16, 16>}, {pipeline_mode = #tpu.pipeline_mode<synchronous>, transform_indices = @transform_2, window_bounds = array<i64: 32, 128>}, {pipeline_mode = #tpu.pipeline_mode<synchronous>, transform_indices = @transform_3, window_bounds = array<i64: 1, 128>}, {pipeline_mode = #tpu.pipeline_mode<synchronous>, transform_indices = @transform_4, window_bounds = array<i64: 128, 32>}, {pipeline_mode = #tpu.pipeline_mode<synchronous>, transform_indices = @transform_5, window_bounds = array<i64: 1, 32>}, {pipeline_mode = #tpu.pipeline_mode<synchronous>, transform_indices = @transform_6, window_bounds = array<i64: 48, 32>}]} {
    %c0 = arith.constant 0 : index
    %c0_0 = arith.constant 0 : index
    %0 = vector.load %arg1[%c0, %c0_0] : memref<48x8xf32, #tpu.memory_space<vmem>>, vector<48x8xf32>
    %c0_1 = arith.constant 0 : index
    %c0_2 = arith.constant 0 : index
    %1 = vector.load %arg3[%c0_1, %c0_2] : memref<32x128xf32, #tpu.memory_space<vmem>>, vector<8x128xf32>
    %cst = arith.constant dense<0.000000e+00> : vector<48x128xf32>
    %2 = tpu.matmul %0, %1, %cst {dimension_numbers = #tpu.dot_dimension_numbers<[1], [0], [0], [1], [0, 0, 1, 1], [], []>} : vector<48x8xf32>, vector<8x128xf32>, vector<48x128xf32> -> vector<48x128xf32>
    %c0_3 = arith.constant 0 : index
    %c0_4 = arith.constant 0 : index
    %c0_5 = arith.constant 0 : index
    %3 = vector.load %arg2[%c0_3, %c0_4, %c0_5] : memref<3x16x16xf32, #tpu.memory_space<vmem>>, vector<1x16x16xf32>
    %4 = vector.shape_cast %3 : vector<1x16x16xf32> to vector<16x16xf32>
    %5 = vector.extract_strided_slice %0 {offsets = [0, 0], sizes = [16, 8], strides = [1, 1]} : vector<48x8xf32> to vector<16x8xf32>
    %cst_6 = arith.constant dense<0.000000e+00> : vector<16x8xf32>
    %6 = tpu.matmul %4, %5, %cst_6 {dimension_numbers = #tpu.dot_dimension_numbers<[1], [0], [0], [1], [0, 0, 1, 1], [], []>} : vector<16x16xf32>, vector<16x8xf32>, vector<16x8xf32> -> vector<16x8xf32>
    %c1 = arith.constant 1 : index
    %c0_7 = arith.constant 0 : index
    %c0_8 = arith.constant 0 : index
    %7 = vector.load %arg2[%c1, %c0_7, %c0_8] : memref<3x16x16xf32, #tpu.memory_space<vmem>>, vector<1x16x16xf32>
    %8 = vector.shape_cast %7 : vector<1x16x16xf32> to vector<16x16xf32>
    %9 = vector.extract_strided_slice %0 {offsets = [16, 0], sizes = [16, 8], strides = [1, 1]} : vector<48x8xf32> to vector<16x8xf32>
    %cst_9 = arith.constant dense<0.000000e+00> : vector<16x8xf32>
    %10 = tpu.matmul %8, %9, %cst_9 {dimension_numbers = #tpu.dot_dimension_numbers<[1], [0], [0], [1], [0, 0, 1, 1], [], []>} : vector<16x16xf32>, vector<16x8xf32>, vector<16x8xf32> -> vector<16x8xf32>
    %c2 = arith.constant 2 : index
    %c0_10 = arith.constant 0 : index
    %c0_11 = arith.constant 0 : index
    %11 = vector.load %arg2[%c2, %c0_10, %c0_11] : memref<3x16x16xf32, #tpu.memory_space<vmem>>, vector<1x16x16xf32>
    %12 = vector.shape_cast %11 : vector<1x16x16xf32> to vector<16x16xf32>
    %13 = vector.extract_strided_slice %0 {offsets = [32, 0], sizes = [16, 8], strides = [1, 1]} : vector<48x8xf32> to vector<16x8xf32>
    %cst_12 = arith.constant dense<0.000000e+00> : vector<16x8xf32>
    %14 = tpu.matmul %12, %13, %cst_12 {dimension_numbers = #tpu.dot_dimension_numbers<[1], [0], [0], [1], [0, 0, 1, 1], [], []>} : vector<16x16xf32>, vector<16x8xf32>, vector<16x8xf32> -> vector<16x8xf32>
    %15 = tpu.concatenate %6, %10, %14 in 0 : vector<16x8xf32>, vector<16x8xf32>, vector<16x8xf32> -> vector<48x8xf32>
    %c8 = arith.constant 8 : index
    %c0_13 = arith.constant 0 : index
    %16 = vector.load %arg3[%c8, %c0_13] : memref<32x128xf32, #tpu.memory_space<vmem>>, vector<8x128xf32>
    %cst_14 = arith.constant dense<0.000000e+00> : vector<48x128xf32>
    %17 = tpu.matmul %15, %16, %cst_14 {dimension_numbers = #tpu.dot_dimension_numbers<[1], [0], [0], [1], [0, 0, 1, 1], [], []>} : vector<48x8xf32>, vector<8x128xf32>, vector<48x128xf32> -> vector<48x128xf32>
    %18 = arith.addf %2, %17 : vector<48x128xf32>
    %c0_15 = arith.constant 0 : index
    %c0_16 = arith.constant 0 : index
    %c0_17 = arith.constant 0 : index
    %19 = vector.load %arg2[%c0_15, %c0_16, %c0_17] : memref<3x16x16xf32, #tpu.memory_space<vmem>>, vector<1x16x16xf32>
    %20 = vector.shape_cast %19 : vector<1x16x16xf32> to vector<16x16xf32>
    %21 = vector.extract_strided_slice %15 {offsets = [0, 0], sizes = [16, 8], strides = [1, 1]} : vector<48x8xf32> to vector<16x8xf32>
    %cst_18 = arith.constant dense<0.000000e+00> : vector<16x8xf32>
    %22 = tpu.matmul %20, %21, %cst_18 {dimension_numbers = #tpu.dot_dimension_numbers<[1], [0], [0], [1], [0, 0, 1, 1], [], []>} : vector<16x16xf32>, vector<16x8xf32>, vector<16x8xf32> -> vector<16x8xf32>
    %c1_19 = arith.constant 1 : index
    %c0_20 = arith.constant 0 : index
    %c0_21 = arith.constant 0 : index
    %23 = vector.load %arg2[%c1_19, %c0_20, %c0_21] : memref<3x16x16xf32, #tpu.memory_space<vmem>>, vector<1x16x16xf32>
    %24 = vector.shape_cast %23 : vector<1x16x16xf32> to vector<16x16xf32>
    %25 = vector.extract_strided_slice %15 {offsets = [16, 0], sizes = [16, 8], strides = [1, 1]} : vector<48x8xf32> to vector<16x8xf32>
    %cst_22 = arith.constant dense<0.000000e+00> : vector<16x8xf32>
    %26 = tpu.matmul %24, %25, %cst_22 {dimension_numbers = #tpu.dot_dimension_numbers<[1], [0], [0], [1], [0, 0, 1, 1], [], []>} : vector<16x16xf32>, vector<16x8xf32>, vector<16x8xf32> -> vector<16x8xf32>
    %c2_23 = arith.constant 2 : index
    %c0_24 = arith.constant 0 : index
    %c0_25 = arith.constant 0 : index
    %27 = vector.load %arg2[%c2_23, %c0_24, %c0_25] : memref<3x16x16xf32, #tpu.memory_space<vmem>>, vector<1x16x16xf32>
    %28 = vector.shape_cast %27 : vector<1x16x16xf32> to vector<16x16xf32>
    %29 = vector.extract_strided_slice %15 {offsets = [32, 0], sizes = [16, 8], strides = [1, 1]} : vector<48x8xf32> to vector<16x8xf32>
    %cst_26 = arith.constant dense<0.000000e+00> : vector<16x8xf32>
    %30 = tpu.matmul %28, %29, %cst_26 {dimension_numbers = #tpu.dot_dimension_numbers<[1], [0], [0], [1], [0, 0, 1, 1], [], []>} : vector<16x16xf32>, vector<16x8xf32>, vector<16x8xf32> -> vector<16x8xf32>
    %31 = tpu.concatenate %22, %26, %30 in 0 : vector<16x8xf32>, vector<16x8xf32>, vector<16x8xf32> -> vector<48x8xf32>
    %c16 = arith.constant 16 : index
    %c0_27 = arith.constant 0 : index
    %32 = vector.load %arg3[%c16, %c0_27] : memref<32x128xf32, #tpu.memory_space<vmem>>, vector<8x128xf32>
    %cst_28 = arith.constant dense<0.000000e+00> : vector<48x128xf32>
    %33 = tpu.matmul %31, %32, %cst_28 {dimension_numbers = #tpu.dot_dimension_numbers<[1], [0], [0], [1], [0, 0, 1, 1], [], []>} : vector<48x8xf32>, vector<8x128xf32>, vector<48x128xf32> -> vector<48x128xf32>
    %34 = arith.addf %18, %33 : vector<48x128xf32>
    %c0_29 = arith.constant 0 : index
    %c0_30 = arith.constant 0 : index
    %c0_31 = arith.constant 0 : index
    %35 = vector.load %arg2[%c0_29, %c0_30, %c0_31] : memref<3x16x16xf32, #tpu.memory_space<vmem>>, vector<1x16x16xf32>
    %36 = vector.shape_cast %35 : vector<1x16x16xf32> to vector<16x16xf32>
    %37 = vector.extract_strided_slice %31 {offsets = [0, 0], sizes = [16, 8], strides = [1, 1]} : vector<48x8xf32> to vector<16x8xf32>
    %cst_32 = arith.constant dense<0.000000e+00> : vector<16x8xf32>
    %38 = tpu.matmul %36, %37, %cst_32 {dimension_numbers = #tpu.dot_dimension_numbers<[1], [0], [0], [1], [0, 0, 1, 1], [], []>} : vector<16x16xf32>, vector<16x8xf32>, vector<16x8xf32> -> vector<16x8xf32>
    %c1_33 = arith.constant 1 : index
    %c0_34 = arith.constant 0 : index
    %c0_35 = arith.constant 0 : index
    %39 = vector.load %arg2[%c1_33, %c0_34, %c0_35] : memref<3x16x16xf32, #tpu.memory_space<vmem>>, vector<1x16x16xf32>
    %40 = vector.shape_cast %39 : vector<1x16x16xf32> to vector<16x16xf32>
    %41 = vector.extract_strided_slice %31 {offsets = [16, 0], sizes = [16, 8], strides = [1, 1]} : vector<48x8xf32> to vector<16x8xf32>
    %cst_36 = arith.constant dense<0.000000e+00> : vector<16x8xf32>
    %42 = tpu.matmul %40, %41, %cst_36 {dimension_numbers = #tpu.dot_dimension_numbers<[1], [0], [0], [1], [0, 0, 1, 1], [], []>} : vector<16x16xf32>, vector<16x8xf32>, vector<16x8xf32> -> vector<16x8xf32>
    %c2_37 = arith.constant 2 : index
    %c0_38 = arith.constant 0 : index
    %c0_39 = arith.constant 0 : index
    %43 = vector.load %arg2[%c2_37, %c0_38, %c0_39] : memref<3x16x16xf32, #tpu.memory_space<vmem>>, vector<1x16x16xf32>
    %44 = vector.shape_cast %43 : vector<1x16x16xf32> to vector<16x16xf32>
    %45 = vector.extract_strided_slice %31 {offsets = [32, 0], sizes = [16, 8], strides = [1, 1]} : vector<48x8xf32> to vector<16x8xf32>
    %cst_40 = arith.constant dense<0.000000e+00> : vector<16x8xf32>
    %46 = tpu.matmul %44, %45, %cst_40 {dimension_numbers = #tpu.dot_dimension_numbers<[1], [0], [0], [1], [0, 0, 1, 1], [], []>} : vector<16x16xf32>, vector<16x8xf32>, vector<16x8xf32> -> vector<16x8xf32>
    %47 = tpu.concatenate %38, %42, %46 in 0 : vector<16x8xf32>, vector<16x8xf32>, vector<16x8xf32> -> vector<48x8xf32>
    %c24 = arith.constant 24 : index
    %c0_41 = arith.constant 0 : index
    %48 = vector.load %arg3[%c24, %c0_41] : memref<32x128xf32, #tpu.memory_space<vmem>>, vector<8x128xf32>
    %cst_42 = arith.constant dense<0.000000e+00> : vector<48x128xf32>
    %49 = tpu.matmul %47, %48, %cst_42 {dimension_numbers = #tpu.dot_dimension_numbers<[1], [0], [0], [1], [0, 0, 1, 1], [], []>} : vector<48x8xf32>, vector<8x128xf32>, vector<48x128xf32> -> vector<48x128xf32>
    %50 = arith.addf %34, %49 : vector<48x128xf32>
    %c0_43 = arith.constant 0 : index
    %c0_44 = arith.constant 0 : index
    %51 = vector.load %arg4[%c0_43, %c0_44] : memref<1x128xf32, #tpu.memory_space<vmem>>, vector<1x128xf32>
    %52 = vector.broadcast %51 : vector<1x128xf32> to vector<48x128xf32>
    %53 = arith.addf %50, %52 : vector<48x128xf32>
    %cst_45 = arith.constant 0.000000e+00 : f32
    %54 = vector.broadcast %cst_45 : f32 to vector<48x128xf32>
    %55 = arith.maximumf %53, %54 : vector<48x128xf32>
    %c0_46 = arith.constant 0 : index
    %c0_47 = arith.constant 0 : index
    %56 = vector.load %arg5[%c0_46, %c0_47] : memref<128x32xf32, #tpu.memory_space<vmem>>, vector<128x32xf32>
    %cst_48 = arith.constant dense<0.000000e+00> : vector<48x32xf32>
    %57 = tpu.matmul %55, %56, %cst_48 {dimension_numbers = #tpu.dot_dimension_numbers<[1], [0], [0], [1], [0, 0, 1, 1], [], []>} : vector<48x128xf32>, vector<128x32xf32>, vector<48x32xf32> -> vector<48x32xf32>
    %c0_49 = arith.constant 0 : index
    %c0_50 = arith.constant 0 : index
    %58 = vector.load %arg6[%c0_49, %c0_50] : memref<1x32xf32, #tpu.memory_space<vmem>>, vector<1x32xf32>
    %59 = vector.broadcast %58 : vector<1x32xf32> to vector<48x32xf32>
    %60 = arith.addf %57, %59 : vector<48x32xf32>
    %c0_51 = arith.constant 0 : index
    %c0_52 = arith.constant 0 : index
    %61 = vector.load %arg7[%c0_51, %c0_52] : memref<48x32xf32, #tpu.memory_space<vmem>>, vector<48x32xf32>
    tpu.vector_store %arg7[%c0_51, %c0_52], %60 {strides = array<i32>} : memref<48x32xf32, #tpu.memory_space<vmem>>, vector<48x32xf32>,
    return
  }
  func.func @transform_0(%arg0: i32) -> (i32, i32) {
    %c0_i32 = arith.constant 0 : i32
    %c0_i32_0 = arith.constant 0 : i32
    %c0_i32_1 = arith.constant 0 : i32
    return %c0_i32, %c0_i32_0 : i32, i32
  }
  func.func @transform_1(%arg0: i32) -> (i32, i32, i32) {
    %c0_i32 = arith.constant 0 : i32
    %c0_i32_0 = arith.constant 0 : i32
    %c0_i32_1 = arith.constant 0 : i32
    %c0_i32_2 = arith.constant 0 : i32
    return %c0_i32, %c0_i32_0, %c0_i32_1 : i32, i32, i32
  }
  func.func @transform_2(%arg0: i32) -> (i32, i32) {
    %c0_i32 = arith.constant 0 : i32
    %c0_i32_0 = arith.constant 0 : i32
    %c0_i32_1 = arith.constant 0 : i32
    return %c0_i32, %c0_i32_0 : i32, i32
  }
  func.func @transform_3(%arg0: i32) -> (i32, i32) {
    %c0_i32 = arith.constant 0 : i32
    %c0_i32_0 = arith.constant 0 : i32
    %c0_i32_1 = arith.constant 0 : i32
    return %c0_i32, %c0_i32_0 : i32, i32
  }
  func.func @transform_4(%arg0: i32) -> (i32, i32) {
    %c0_i32 = arith.constant 0 : i32
    %c0_i32_0 = arith.constant 0 : i32
    %c0_i32_1 = arith.constant 0 : i32
    return %c0_i32, %c0_i32_0 : i32, i32
  }
  func.func @transform_5(%arg0: i32) -> (i32, i32) {
    %c0_i32 = arith.constant 0 : i32
    %c0_i32_0 = arith.constant 0 : i32
    %c0_i32_1 = arith.constant 0 : i32
    return %c0_i32, %c0_i32_0 : i32, i32
  }
  func.func @transform_6(%arg0: i32) -> (i32, i32) {
    %c0_i32 = arith.constant 0 : i32
    %c0_i32_0 = arith.constant 0 : i32
    %c0_i32_1 = arith.constant 0 : i32
    return %c0_i32, %c0_i32_0 : i32, i32
  }
}

</mosaic_0001>

<bundles_post_ra>
// kernel: fwd.1
= control target key start
LH: loop header
LB: loop body
LE: loop exit
PB: predicated region body
PF: predicated region fallthrough
CT: control target
= control target key end

     0   :  { %vm33_vm0 = vcmask 130048   ;;  %s1986_s0 = inlined_call_operand.vmem [shape: f32[48,8], index: 0, kind: input, shape index: {}]   ;;  %s1987_s1 = inlined_call_operand.vmem [shape: f32[3,16,16], index: 1, kind: input, shape index: {}]   ;;  %s1988_s2 = inlined_call_operand.vmem [shape: f32[32,128], index: 2, kind: input, shape index: {}]   ;;  %s1989_s3 = inlined_call_operand.vmem [shape: f32[1,128], index: 3, kind: input, shape index: {}]   ;;  %s1990_s4 = inlined_call_operand.vmem [shape: f32[128,32], index: 4, kind: input, shape index: {}]   ;;  %s1991_s5 = inlined_call_operand.vmem [shape: f32[1,32], index: 5, kind: input, shape index: {}]   ;;  %s1992_s6 = inlined_call_operand.hbm [shape: f32[48,32], index: 6, kind: output, shape index: {}]  }
   0x1   :  { %v24_v0 = vld [vmem:[%s1986_s0] sm:$0xff]  ;;  %v25_v1 = vld [vmem:[%s1986_s0 + $0x8] sm:$0xff]  ;;  %v26_v4 = vld [vmem:[%s1986_s0 + $0x10] sm:$0xff] }
   0x2   :  { %v1803_v2 = vld [vmem:[%s1987_s1] sm:$0xff]  ;;  %v1643_v3 = vpack.c.bf16 %v25_v1, %v24_v0  ;;  %v27_v5 = vld [vmem:[%s1986_s0 + $0x18] sm:$0xff]  ;;  %v29_v8 = vld [vmem:[%s1986_s0 + $0x28] sm:$0xff] }
   0x3   :  { %1499 = vmatprep.mubr.msk.f32.mxu1 %vm33_vm0, %v1803_v2  ;;  %1542 = vmatprep.mubr.msk.f32.mxu0 %vm33_vm0, %v1803_v2  ;;  %v1647_v6 = vpack.c.bf16 %v27_v5, %v26_v4  ;;  %v28_v7 = vld [vmem:[%s1986_s0 + $0x20] sm:$0xff]  ;;  %v1824_v9 = vld [vmem:[%s1987_s1 + $0x8] sm:$0xff] }
   0x4   :  { %1644 = vmatprep.subr.bf16.mxu1 %v1643_v3 }
   0x5   :  { %1646 = vmatpush3.bf16.msra.mxu1 %v1643_v3 }
   0x6   :  { %11 = vsyncpa [#allocation3], 0  ;;  %1648 = vmatprep.subr.bf16.mxu1 %v1647_v6  ;;  %v1829_v10 = vld [vmem:[%s1987_s1 + $0x10] sm:$0xff]  ;;  %v1651_v11 = vpack.c.bf16 %v29_v8, %v28_v7  ;;  %v1838_v12 = vld [vmem:[%s1987_s1 + $0x18] sm:$0xff]  ;;  %vm284_vm1 = vcmask 64512   ;;  %vm1338_vm2 = vcmask 261120  }
   0x7   :  { %v1843_v13 = vld [vmem:[%s1987_s1 + $0x20] sm:$0xff]  ;;  %v1852_v14 = vld [vmem:[%s1987_s1 + $0x28] sm:$0xff]  ;;  %v736_v26 = vld [vmem:[%s1988_s2 + $0x10] sm:$0xff]  ;;  %s1756_s9 = smov [#allocation2]  }
   0x8   :  { %1500 = vmatmul.mubr.msk.f32.vlgmr.msra.gmra.mrb[0].mxu1 %vm33_vm0, %v1824_v9  ;;  %v283_v15 = vld [vmem:[%s1988_s2 + $0x8] sm:$0xff]  ;;  %v30_v16 = vld [vmem:[%s1988_s2] sm:$0xff]  ;;  %v1081_v27 = vld [vmem:[%s1988_s2 + $0x18] sm:$0xff]  ;;  %s1350_s10 = sshll.u32 %s1756_s9, 4  ;;  %s1351_s10 = int_to_ptr.vmem [resolvable:$true] %s1350_s10 }
   0x9   :  { %1650 = vmatpush3.bf16.msra.mxu1 %v1647_v6  ;;  %1506 = vmatprep.mubr.msk.f32.mxu1 %vm33_vm0, %v1829_v10  ;;  %v1220_v37 = vld [vmem:[%s1990_s4] sm:$0xff]  ;;  %v1221_v38 = vld [vmem:[%s1990_s4 + $0x8] sm:$0xff]  ;;  %v1222_v39 = vld [vmem:[%s1990_s4 + $0x10] sm:$0xff]  ;;  %p1737_p1 = scmp.lt.s32.totalorder %s1351_s10, %s1351_s10 }
   0xa   :  { %1652 = vmatprep.subr.bf16.mxu1 %v1651_v11  ;;  %v1679_v40 = vpack.c.bf16 %v1221_v38, %v1220_v37  ;;  %v1223_v41 = vld [vmem:[%s1990_s4 + $0x18] sm:$0xff]  ;;  %v1224_v43 = vld [vmem:[%s1990_s4 + $0x20] sm:$0xff]  ;;  %v1225_v44 = vld [vmem:[%s1990_s4 + $0x28] sm:$0xff] }
   0xb   :  { %v1683_v42 = vpack.c.bf16 %v1223_v41, %v1222_v39  ;;  %v1687_v45 = vpack.c.bf16 %v1225_v44, %v1224_v43  ;;  %v1226_v46 = vld [vmem:[%s1990_s4 + $0x30] sm:$0xff]  ;;  %v1227_v47 = vld [vmem:[%s1990_s4 + $0x38] sm:$0xff]  ;;  %v1228_v49 = vld [vmem:[%s1990_s4 + $0x40] sm:$0xff] }
   0xc   :  { %1507 = vmatmul.mubr.msk.f32.vlgmr.msra.gmra.mrb[2].mxu1 %vm33_vm0, %v1838_v12  ;;  %v1691_v48 = vpack.c.bf16 %v1227_v47, %v1226_v46  ;;  %v1229_v50 = vld [vmem:[%s1990_s4 + $0x48] sm:$0xff]  ;;  %v1230_v52 = vld [vmem:[%s1990_s4 + $0x50] sm:$0xff]  ;;  %v1231_v53 = vld [vmem:[%s1990_s4 + $0x58] sm:$0xff] }
   0xd   :  { %1654 = vmatpush3.bf16.msra.mxu1 %v1651_v11  ;;  %1513 = vmatprep.mubr.msk.f32.mxu1 %vm33_vm0, %v1843_v13  ;;  %v1695_v51 = vpack.c.bf16 %v1229_v50, %v1228_v49  ;;  %v1699_v54 = vpack.c.bf16 %v1231_v53, %v1230_v52  ;;  %v1232_v55 = vld [vmem:[%s1990_s4 + $0x60] sm:$0xff]  ;;  %v1233_v56 = vld [vmem:[%s1990_s4 + $0x68] sm:$0xff] }
   0xe   :  { %1516 = vmatprep.subr.mxu1 %v283_v15  ;;  %v1703_v57 = vpack.c.bf16 %v1233_v56, %v1232_v55  ;;  %v1407_v3 = vld [vmem:[%s1989_s3] ss:$0 sm:$0xff] }
  0x10   :  { %1514 = vmatmul.mubr.msk.f32.vlgmr.msra.gmra.mrb[4].mxu1 %vm33_vm0, %v1852_v14 }
  0x11   :  { %1517 = vmatpush3.msra.mxu1 %v283_v15 }
  0x12   :  { %1527 = vmatprep.subr.mxu1 %v30_v16 }
  0xdb   :  { %v1501_v17 = vpop.f32.mrb[0].mxu1 }
  0xdc   :  { %v106_v18 = vpop.f32.mrb[1].mxu1 }
  0xdd   :  { %1518 = vmatprep.mubr.msk.f32.mxu1 %vm284_vm1, %v106_v18  ;;  %v1655_v19 = vpack.c.bf16 %v1501_v17, %v106_v18 }
  0xde   :  { %1519 = vmatmul.mubr.msk.f32.vlgmr.msra.gmra.mrb[6].mxu1 %vm284_vm1, %v1501_v17 }
  0xdf   :  { %v1508_v20 = vpop.f32.mrb[2].mxu1  ;;  %1656 = vmatprep.subr.bf16.mxu0 %v1655_v19  ;;  %1528 = vmatpush3.msra.mxu1 %v30_v16 }
  0xe0   :  { %v190_v21 = vpop.f32.mrb[3].mxu1  ;;  %1658 = vmatpush3.bf16.msra.mxu0 %v1655_v19  ;;  %1559 = vmatprep.subr.mxu1 %v736_v26 }
  0xe1   :  { %v1659_v22 = vpack.c.bf16 %v1508_v20, %v190_v21  ;;  %1521 = vmatprep.mubr.msk.f32.mxu1 %vm284_vm1, %v190_v21 }
  0xe2   :  { %1522 = vmatmul.mubr.msk.f32.gmra.mrb[8].mxu1 %vm284_vm1, %v1508_v20 }
  0xe3   :  { %v1515_v23 = vpop.f32.mrb[4].mxu1  ;;  %1543 = vmatmul.mubr.msk.f32.vlgmr.msra.gmra.mrb[0].mxu0 %vm33_vm0, %v1824_v9  ;;  %1660 = vmatprep.subr.bf16.mxu0 %v1659_v22 }
  0xe4   :  { %v274_v24 = vpop.f32.mrb[5].mxu1  ;;  %1662 = vmatpush3.bf16.msra.mxu0 %v1659_v22  ;;  %1549 = vmatprep.mubr.msk.f32.mxu0 %vm33_vm0, %v1829_v10  ;;  %v1408_v22 = vld [vmem:[%s1991_s5] ss:$0 sm:$0xff]  ;;  %s1732_s5 = scalar_lea.vmem %s1351_s10, 768 }
  0xe5   :  { %v1663_v25 = vpack.c.bf16 %v1515_v23, %v274_v24  ;;  %1524 = vmatprep.mubr.msk.f32.mxu1 %vm284_vm1, %v274_v24  ;;  %p1733_p0 = scmp.ne.s32.totalorder %s1351_s10, %s1732_s5  ;;  %p1738_p2 = scmp.lt.s32.totalorder %s1732_s5, %s1732_s5 }
  0xe6   :  { %1525 = vmatmul.mubr.msk.f32.gmra.mrb[10].mxu1 %vm284_vm1, %v1515_v23 }
  0xe7   :  { %1550 = vmatmul.mubr.msk.f32.vlgmr.msra.gmra.mrb[2].mxu0 %vm33_vm0, %v1838_v12  ;;  %1664 = vmatprep.subr.bf16.mxu0 %v1663_v25  ;;  %p1739_p3 = por %p1738_p2, %p1737_p1 }
  0xe8   :  { %1666 = vmatpush3.bf16.msra.mxu0 %v1663_v25  ;;  %1556 = vmatprep.mubr.msk.f32.mxu0 %vm33_vm0, %v1843_v13 }
  0xe9   :  { %1529 = vmatprep.mubr.msk.f32.mxu1 %vm284_vm1, %v24_v0  ;;  %v1234_v0 = vld [vmem:[%s1990_s4 + $0x70] sm:$0xff]  ;;  %p1740_p4 = pnand %p1739_p3, %p1733_p0 }
  0xea   :  { %1530 = vmatmul.mubr.msk.f32.vlgmr.msra.gmra.mrb[6].mxu1 %vm284_vm1, %v25_v1  ;;  %v1235_v1 = vld [vmem:[%s1990_s4 + $0x78] sm:$0xff] }
  0xeb   :  { %1557 = vmatmul.mubr.msk.f32.vlgmr.msra.gmra.mrb[4].mxu0 %vm33_vm0, %v1852_v14  ;;  %1532 = vmatprep.mubr.msk.f32.mxu1 %vm284_vm1, %v26_v4 }
  0xec   :  { %1574 = vmatprep.mubr.msk.f32.mxu0 %vm33_vm0, %v1803_v2  ;;  %1560 = vmatpush3.msra.mxu1 %v736_v26  ;;  %v1707_v2 = vpack.c.bf16 %v1235_v1, %v1234_v0 }
  0xed   :  { %1591 = vmatprep.subr.mxu1 %v1081_v27 }
  0xee   :  { %1533 = vmatmul.mubr.msk.f32.gmra.mrb[8].mxu1 %vm284_vm1, %v27_v5 }
  0xef   :  { %1535 = vmatprep.mubr.msk.f32.mxu1 %vm284_vm1, %v28_v7 }
  0xf2   :  { %1536 = vmatmul.mubr.msk.f32.gmra.mrb[10].mxu1 %vm284_vm1, %v29_v8 }
 0x1b6   :  { %v1544_v28 = vpop.f32.mrb[0].mxu0 }
 0x1b7   :  { %v577_v29 = vpop.f32.mrb[1].mxu0 }
 0x1b8   :  { %v1667_v30 = vpack.c.bf16 %v1544_v28, %v577_v29  ;;  %1561 = vmatprep.mubr.msk.f32.mxu1 %vm284_vm1, %v577_v29 }
 0x1b9   :  { %1562 = vmatmul.mubr.msk.f32.vlgmr.msra.gmra.mrb[6].mxu1 %vm284_vm1, %v1544_v28 }
 0x1ba   :  { %v1551_v31 = vpop.f32.mrb[2].mxu0  ;;  %1668 = vmatprep.subr.bf16.mxu0 %v1667_v30  ;;  %1592 = vmatpush3.msra.mxu1 %v1081_v27 }
 0x1bb   :  { %v652_v32 = vpop.f32.mrb[3].mxu0  ;;  %1670 = vmatpush3.bf16.msra.mxu0 %v1667_v30 }
 0x1bc   :  { %v1671_v33 = vpack.c.bf16 %v1551_v31, %v652_v32  ;;  %1564 = vmatprep.mubr.msk.f32.mxu1 %vm284_vm1, %v652_v32 }
 0x1bd   :  { %1565 = vmatmul.mubr.msk.f32.gmra.mrb[8].mxu1 %vm284_vm1, %v1551_v31 }
 0x1be   :  { %v1558_v34 = vpop.f32.mrb[4].mxu0  ;;  %1575 = vmatmul.mubr.msk.f32.vlgmr.msra.gmra.mrb[6].mxu0 %vm33_vm0, %v1824_v9  ;;  %1672 = vmatprep.subr.bf16.mxu0 %v1671_v33 }
 0x1bf   :  { %v727_v35 = vpop.f32.mrb[5].mxu0  ;;  %1674 = vmatpush3.bf16.msra.mxu0 %v1671_v33  ;;  %1581 = vmatprep.mubr.msk.f32.mxu0 %vm33_vm0, %v1829_v10 }
 0x1c0   :  { %v1675_v36 = vpack.c.bf16 %v1558_v34, %v727_v35  ;;  %1567 = vmatprep.mubr.msk.f32.mxu1 %vm284_vm1, %v727_v35 }
 0x1c1   :  { %1568 = vmatmul.mubr.msk.f32.gmra.mrb[10].mxu1 %vm284_vm1, %v1558_v34 }
 0x1c2   :  { %1582 = vmatmul.mubr.msk.f32.vlgmr.msra.gmra.mrb[8].mxu0 %vm33_vm0, %v1838_v12  ;;  %1676 = vmatprep.subr.bf16.mxu0 %v1675_v36 }
 0x1c3   :  { %1678 = vmatpush3.bf16.msra.mxu0 %v1675_v36  ;;  %1588 = vmatprep.mubr.msk.f32.mxu0 %vm33_vm0, %v1843_v13 }
 0x1c4   :  { %1680 = vmatprep.subr.bf16.mxu0 %v1679_v40 }
 0x1c6   :  { %1589 = vmatmul.mubr.msk.f32.vlgmr.msra.gmra.mrb[10].mxu0 %vm33_vm0, %v1852_v14 }
 0x1c7   :  { %1682 = vmatpush3.bf16.msra.mxu0 %v1679_v40 }
 0x1c8   :  { %1684 = vmatprep.subr.bf16.mxu0 %v1683_v42 }
 0x1cb   :  { %1686 = vmatpush3.bf16.msra.mxu0 %v1683_v42 }
 0x1cc   :  { %1688 = vmatprep.subr.bf16.mxu0 %v1687_v45 }
 0x1cf   :  { %1690 = vmatpush3.bf16.msra.mxu0 %v1687_v45 }
 0x1d0   :  { %1692 = vmatprep.subr.bf16.mxu0 %v1691_v48 }
 0x1d3   :  { %1694 = vmatpush3.bf16.msra.mxu0 %v1691_v48 }
 0x1d4   :  { %1696 = vmatprep.subr.bf16.mxu0 %v1695_v51 }
 0x1d7   :  { %1698 = vmatpush3.bf16.msra.mxu0 %v1695_v51 }
 0x1d8   :  { %1700 = vmatprep.subr.bf16.mxu0 %v1699_v54 }
 0x1db   :  { %1702 = vmatpush3.bf16.msra.mxu0 %v1699_v54 }
 0x1dc   :  { %1704 = vmatprep.subr.bf16.mxu0 %v1703_v57 }
 0x1df   :  { %1706 = vmatpush3.bf16.msra.mxu0 %v1703_v57 }
 0x1e0   :  { %1708 = vmatprep.subr.bf16.mxu0 %v1707_v2 }
 0x1e3   :  { %1710 = vmatpush3.bf16.msra.mxu0 %v1707_v2 }
 0x291   :  { %v1576_v58 = vpop.f32.mrb[6].mxu0 }
 0x292   :  { %v922_v59 = vpop.f32.mrb[7].mxu0 }
 0x293   :  { %1593 = vmatprep.mubr.msk.f32.mxu1 %vm284_vm1, %v922_v59 }
 0x294   :  { %1594 = vmatmul.mubr.msk.f32.vlgmr.msra.gmra.mrb[6].mxu1 %vm284_vm1, %v1576_v58 }
 0x295   :  { %v1583_v60 = vpop.f32.mrb[8].mxu0 }
 0x296   :  { %v997_v61 = vpop.f32.mrb[9].mxu0 }
 0x297   :  { %1596 = vmatprep.mubr.msk.f32.mxu1 %vm284_vm1, %v997_v61 }
 0x298   :  { %1597 = vmatmul.mubr.msk.f32.gmra.mrb[8].mxu1 %vm284_vm1, %v1583_v60 }
 0x299   :  { %v1590_v62 = vpop.f32.mrb[10].mxu0 }
 0x29a   :  { %v1072_v63 = vpop.f32.mrb[11].mxu0 }
 0x29b   :  { %1599 = vmatprep.mubr.msk.f32.mxu1 %vm284_vm1, %v1072_v63 }
 0x29c   :  { %1600 = vmatmul.mubr.msk.f32.gmra.mrb[10].mxu1 %vm284_vm1, %v1590_v62 }
 0x367   :  { %v1595_v4 = vpop.f32.mrb[6].mxu1 }
 0x368   :  { %v1209_v5 = vadd.f32 %v1595_v4, %v1407_v3  ;;  %v1166_v6 = vpop.f32.mrb[7].mxu1 }
 0x369   :  { %v1208_v7 = vadd.f32 %v1407_v3, %v1166_v6 }
 0x36a   :  { %v1215_v10 = vmax.f32 %v1209_v5, 0.0 }
 0x36b   :  { %v1214_v8 = vmax.f32 %v1208_v7, 0.0  ;;  %v1598_v9 = vpop.f32.mrb[8].mxu1 }
 0x36c   :  { %v1211_v11 = vadd.f32 %v1598_v9, %v1407_v3  ;;  %v1176_v12 = vpop.f32.mrb[9].mxu1 }
 0x36d   :  { %v1210_v13 = vadd.f32 %v1407_v3, %v1176_v12  ;;  %1634 = vmatprep.mubr.f32.mxu0 %v1214_v8 }
 0x36e   :  { %1635 = vmatmul.mubr.f32.vlgmr.msra.gmra.mrb[12].mxu0 %v1215_v10  ;;  %v1217_v16 = vmax.f32 %v1211_v11, 0.0 }
 0x36f   :  { %v1216_v14 = vmax.f32 %v1210_v13, 0.0  ;;  %v1601_v15 = vpop.f32.mrb[10].mxu1 }
 0x370   :  { %v1213_v17 = vadd.f32 %v1601_v15, %v1407_v3  ;;  %v1186_v18 = vpop.f32.mrb[11].mxu1 }
 0x371   :  { %v1212_v19 = vadd.f32 %v1407_v3, %v1186_v18  ;;  %1637 = vmatprep.mubr.f32.mxu0 %v1216_v14 }
 0x372   :  { %1638 = vmatmul.mubr.f32.gmra.mrb[14].mxu0 %v1217_v16  ;;  %v1219_v21 = vmax.f32 %v1213_v17, 0.0 }
 0x373   :  { %v1218_v20 = vmax.f32 %v1212_v19, 0.0 }
 0x375   :  { %1640 = vmatprep.mubr.f32.mxu0 %v1218_v20 }
 0x376   :  { %1641 = vmatmul.mubr.f32.gmra.mrb[16].mxu0 %v1219_v21 }
 0x441   :  { %v1636_v23 = vpop.f32.mrb[12].mxu0 }
 0x442   :  { %v1315_v24 = vadd.f32 %v1636_v23, %v1408_v22  ;;  %v1309_v25 = vpop.f32.mrb[13].mxu0 }
 0x443   :  { %v1310_v26 = vadd.f32 %v1408_v22, %v1309_v25 }
 0x444   :  { %1340 = vst.msk [vmem:[#allocation2 + $0x8] sm:$0xff] %vm1338_vm2, %v1315_v24 }
 0x445   :  { %1339 = vst.msk [vmem:[#allocation2] sm:$0xff] %vm1338_vm2, %v1310_v26  ;;  %v1639_v27 = vpop.f32.mrb[14].mxu0 }
 0x446   :  { %v1325_v28 = vadd.f32 %v1639_v27, %v1408_v22  ;;  %v1319_v29 = vpop.f32.mrb[15].mxu0 }
 0x447   :  { %v1320_v30 = vadd.f32 %v1408_v22, %v1319_v29 }
 0x448   :  { %1342 = vst.msk [vmem:[#allocation2 + $0x18] sm:$0xff] %vm1338_vm2, %v1325_v28 }
 0x449   :  { %1341 = vst.msk [vmem:[#allocation2 + $0x10] sm:$0xff] %vm1338_vm2, %v1320_v30  ;;  %v1642_v31 = vpop.f32.mrb[16].mxu0 }
 0x44a   :  { %v1335_v32 = vadd.f32 %v1642_v31, %v1408_v22  ;;  %v1329_v33 = vpop.f32.mrb[17].mxu0 }
 0x44b   :  { %v1330_v34 = vadd.f32 %v1408_v22, %v1329_v33 }
 0x44c   :  { %1344 = vst.msk [vmem:[#allocation2 + $0x28] sm:$0xff] %vm1338_vm2, %v1335_v32 }
 0x44d   :  { %1343 = vst.msk [vmem:[#allocation2 + $0x20] sm:$0xff] %vm1338_vm2, %v1330_v34 }
 0x44e   :  { %1743 = shalt.err (!%p1740_p4)
}
 0x44f   :  { %s1744_s13 = scalar_lea.hbm %s1992_s6, 768 }
 0x450   :  { %p1745_p5 = scmp.ne.s32.totalorder %s1992_s6, %s1744_s13  ;;  %p1748_p6 = scmp.lt.u32.totalorder %s1744_s13, %s1992_s6 }
 0x452   :  { %p1750_p7 = pnand %p1748_p6, %p1745_p5 }
 0x454   :  { %1753 = shalt.err (!%p1750_p7)
}
 0x455   :  { %s1757_s17 = smov 128   ;;  %s1758_s18 = smov 8  }
 0x456   :  { %1356 = dma.vmem_to_hbm [thread:$0]  %s1351_s10, 768, %s1992_s6, [#allocation3], %s1757_s17, %s1757_s17, %s1758_s18  }
 0x457   :  { %1754 = dma.done.wait [#allocation3], 768  }
 0x458   :  { %1755 = vsyncadd [#allocation3], 4294966528 }
 0x459   :  { %1360 = vsyncpa [#allocation3], 1 }

</bundles_post_ra>
